<compile_context>
chip_gen: v7x
topology: tpu7x:2x2x1
jax: 0.10.0
libtpu: 0.0.40
codegen_flags: <defaults>
</compile_context>

<pallas_src>
import functools
import math

import jax
import jax.numpy as jnp
from jax.experimental import pallas as pl
from jax.experimental.pallas import tpu as pltpu


def _round_up(x, m):
    return (x + m - 1) // m * m


def _pad2d(x, rows, cols):
    r, c = x.shape
    if r == rows and c == cols:
        return x
    return jnp.pad(x, ((0, rows - r), (0, cols - c)))


def _pad_cols(x, cols):
    if x.shape[-1] == cols:
        return x
    return jnp.pad(x, ((0, 0), (0, cols - x.shape[-1])))


# ----------------------------- kernel bodies ---------------------------------

def _gate_values(pre, new, wgin_ref, wgout_ref, bgate_ref):
    # pass_gate: sigmoid(gate_linear_in(pre) + gate_linear_out(new)).
    # Two K=Dp MXU matmuls against resident weights (no in-kernel concat);
    # biases pre-summed in the wrapper.
    pre_mm = pre.astype(wgin_ref.dtype)
    logits = (jnp.dot(pre_mm, wgin_ref[...], preferred_element_type=jnp.float32)
              + jnp.dot(new, wgout_ref[...], preferred_element_type=jnp.float32)
              + bgate_ref[...])
    return jax.nn.sigmoid(logits)


def _gated_out(pre, new, gate, out_ref, concat, dp):
    pre_f = pre.astype(jnp.float32)
    new_f = new.astype(jnp.float32)
    if concat:
        # torch.cat((gate*new, (1-gate)*pre), dim=1) as one lane-dense slab.
        out_ref[:, :dp] = (gate * new_f).astype(out_ref.dtype)
        out_ref[:, dp:] = ((1.0 - gate) * pre_f).astype(out_ref.dtype)
    else:
        # gate*new + (1-gate)*pre == pre + gate*(new - pre): one fewer VALU mul.
        out_ref[...] = (pre_f + gate * (new_f - pre_f)).astype(out_ref.dtype)


def _gated_proj_kernel(concat, dp, pre_ref, new_ref, wlin_ref, wgin_ref,
                       wgout_ref, bgate_ref, out_ref):
    pre = jnp.dot(pre_ref[...], wlin_ref[...],
                  preferred_element_type=jnp.float32)
    new = new_ref[...]
    gate = _gate_values(pre, new, wgin_ref, wgout_ref, bgate_ref)
    _gated_out(pre, new, gate, out_ref, concat, dp)


def _gated_id_kernel(concat, dp, pre_ref, new_ref, wgin_ref, wgout_ref,
                     bgate_ref, out_ref):
    pre = pre_ref[...]
    new = new_ref[...]
    gate = _gate_values(pre, new, wgin_ref, wgout_ref, bgate_ref)
    _gated_out(pre, new, gate, out_ref, concat, dp)


def _plain_proj_kernel(concat, dp, pre_ref, new_ref, wlin_ref, out_ref):
    pre = jnp.dot(pre_ref[...], wlin_ref[...],
                  preferred_element_type=jnp.float32)
    new = new_ref[...]
    if concat:
        out_ref[:, :dp] = pre.astype(out_ref.dtype)
        out_ref[:, dp:] = new
    else:
        out_ref[...] = (pre + new.astype(jnp.float32)).astype(out_ref.dtype)


def _plain_id_concat_kernel(dp, pre_ref, new_ref, out_ref):
    out_ref[:, :dp] = pre_ref[...]
    out_ref[:, dp:] = new_ref[...]


# ----------------------------- module wrapper --------------------------------

class SkipConnectionPallas:
    def __init__(self, pre_feature_dim, new_feature_dim,
                 concat_feature=False, use_gate=False, key=None):
        self.input_dim = pre_feature_dim
        self.output_dim = new_feature_dim
        self.concat_feature = concat_feature
        self.use_gate = use_gate
        self.has_proj = (self.input_dim != self.output_dim)

        # Lane-aligned (padded) feature dims; padding only when % 128 != 0.
        self._dp = _round_up(self.output_dim, 128)
        self._prep = _round_up(self.input_dim, 128) if self.has_proj else self._dp

        if key is None:
            key = jax.random.PRNGKey(0)
        k_lin, k_gi_w, k_gi_b, k_go_w, k_go_b = jax.random.split(key, 5)

        # nn.Linear(input_dim, output_dim, bias=False): weight (out, in),
        # init U(-1/sqrt(in), 1/sqrt(in)); stored transposed as (in, out).
        if self.has_proj:
            bound = 1.0 / math.sqrt(self.input_dim)
            self.w_lin = jax.random.uniform(
                k_lin, (self.input_dim, self.output_dim),
                minval=-bound, maxval=bound, dtype=jnp.float32)
            self._w_lin_p = _pad2d(self.w_lin, self._prep, self._dp)
        else:
            # forward() never applies self.linear in this case.
            self.w_lin = None
            self._w_lin_p = None

        if self.use_gate:
            gb = 1.0 / math.sqrt(self.output_dim)
            self.w_gin = jax.random.uniform(
                k_gi_w, (self.output_dim, self.output_dim),
                minval=-gb, maxval=gb, dtype=jnp.float32)
            self.b_gin = jax.random.uniform(
                k_gi_b, (self.output_dim,), minval=-gb, maxval=gb,
                dtype=jnp.float32)
            self.w_gout = jax.random.uniform(
                k_go_w, (self.output_dim, self.output_dim),
                minval=-gb, maxval=gb, dtype=jnp.float32)
            self.b_gout = jax.random.uniform(
                k_go_b, (self.output_dim,), minval=-gb, maxval=gb,
                dtype=jnp.float32)
            self._w_gin_p = _pad2d(self.w_gin, self._dp, self._dp)
            self._w_gout_p = _pad2d(self.w_gout, self._dp, self._dp)
            # Pre-summed gate bias, kept in f32 (added post-accumulation).
            self._b_gate_p = _pad2d((self.b_gin + self.b_gout)[None, :],
                                    1, self._dp)

    # --- tile sizing: generation-aware VMEM budget, >=2 grid steps ----------
    def _choose_tile(self, n_rows, itemsize):
        dp, prep = self._dp, self._prep
        out_w = 2 * dp if self.concat_feature else dp
        row_align = {4: 8, 2: 16, 1: 32}.get(itemsize, 8)

        # Grid-invariant blocks (still double-buffered by the pipeliner).
        resident = 0
        if self.has_proj:
            resident += prep * dp * itemsize
        if self.use_gate:
            resident += 2 * dp * dp * itemsize + dp * 4
        resident *= 2

        # Double-buffered activation/output tiles + f32 compute temporaries
        # (projection result, gate, blend intermediates).
        per_row = 2 * (prep + dp + out_w) * itemsize
        per_row += (3 if self.use_gate else 2) * dp * 4

        try:
            vmem_cap = int(pltpu.get_tpu_info().vmem_capacity_bytes)
        except Exception:
            vmem_cap = 64 * 1024 * 1024   # conservative fallback (v7x-sized)
        budget = min((vmem_cap * 3) // 5, 96 * 1024 * 1024)
        avail = budget - (2 << 20) - resident
        tm = max((avail // per_row) // row_align * row_align, row_align)
        tm = min(tm, 2048)

        if n_rows <= row_align:
            # Single full-extent row block (exception to the (8,128) rule).
            tm = max(n_rows, 1)
        else:
            rows_al = (n_rows // row_align) * row_align
            # >=2 grid steps so v7x's second TensorCore gets work and the
            # row-tile DMAs double-buffer; >=4 when rows allow decent tiles.
            if rows_al >= 8 * row_align:
                min_steps = 4
            elif rows_al >= 2 * row_align:
                min_steps = 2
            else:
                min_steps = 1
            cap = max(row_align, (rows_al // min_steps) // row_align * row_align)
            tm = min(tm, cap)

        footprint = resident + tm * per_row
        limit_cap = (100 * 1024 * 1024 if vmem_cap >= 100 * 1024 * 1024
                     else 48 * 1024 * 1024)
        vmem_limit = int(min(max(footprint + (4 << 20), 16 << 20), limit_cap))
        return tm, out_w, vmem_limit

    def __call__(self, pre_feature, new_feature):
        n = pre_feature.shape[0]
        d = self.output_dim
        io_dtype = jnp.result_type(pre_feature.dtype, new_feature.dtype)

        # Plain identity residual add: XLA already emits this at roofline
        # rate; a Pallas kernel would only add padding copies + grid overhead.
        if not self.has_proj and not self.use_gate and not self.concat_feature:
            return (pre_feature + new_feature).astype(io_dtype)

        dp, prep = self._dp, self._prep
        itemsize = jnp.dtype(io_dtype).itemsize
        tm, out_w, vmem_limit = self._choose_tile(n, itemsize)

        # Native-dtype I/O; lane padding only when dims aren't 128-multiples,
        # no row padding (ragged final row block is masked by the pipeline).
        pre_p = _pad_cols(pre_feature.astype(io_dtype), prep)
        new_p = _pad_cols(new_feature.astype(io_dtype), dp)

        args = [pre_p, new_p]
        in_specs = [pl.BlockSpec((tm, prep), lambda i: (i, 0)),
                    pl.BlockSpec((tm, dp), lambda i: (i, 0))]
        if self.has_proj:
            args.append(self._w_lin_p.astype(io_dtype))
            in_specs.append(pl.BlockSpec((prep, dp), lambda i: (0, 0)))
        if self.use_gate:
            args += [self._w_gin_p.astype(io_dtype),
                     self._w_gout_p.astype(io_dtype),
                     self._b_gate_p]
            in_specs += [pl.BlockSpec((dp, dp), lambda i: (0, 0)),
                         pl.BlockSpec((dp, dp), lambda i: (0, 0)),
                         pl.BlockSpec((1, dp), lambda i: (0, 0))]

        if self.use_gate:
            base = _gated_proj_kernel if self.has_proj else _gated_id_kernel
            kernel = functools.partial(base, self.concat_feature, dp)
        elif self.has_proj:
            kernel = functools.partial(_plain_proj_kernel,
                                       self.concat_feature, dp)
        else:
            # identity + concat (identity + add returned above).
            kernel = functools.partial(_plain_id_concat_kernel, dp)

        out = pl.pallas_call(
            kernel,
            grid=(pl.cdiv(n, tm),),
            in_specs=in_specs,
            out_specs=pl.BlockSpec((tm, out_w), lambda i: (i, 0)),
            out_shape=jax.ShapeDtypeStruct((n, out_w), io_dtype),
            compiler_params=pltpu.CompilerParams(
                dimension_semantics=("parallel",),
                vmem_limit_bytes=vmem_limit),
        )(*args)

        if self.concat_feature:
            if dp == d:
                return out
            return jnp.concatenate([out[:, :d], out[:, dp:dp + d]], axis=1)
        return out if dp == d else out[:, :d]

    # Pure-JAX reference for verification.
    def reference(self, pre_feature, new_feature):
        pre = pre_feature
        if self.has_proj:
            pre = pre @ self.w_lin
        if self.use_gate:
            gate = jax.nn.sigmoid(pre @ self.w_gin + self.b_gin
                                  + new_feature @ self.w_gout + self.b_gout)
            if self.concat_feature:
                return jnp.concatenate(
                    [gate * new_feature, (1.0 - gate) * pre], axis=1)
            return gate * new_feature + (1.0 - gate) * pre
        if self.concat_feature:
            return jnp.concatenate([pre, new_feature], axis=1)
        return pre + new_feature


# ----------------------------- demo ------------------------------------------

if __name__ == "__main__":
    key = jax.random.PRNGKey(0)
    keys = jax.random.split(key, 12)

    N, PRE_DIM, NEW_DIM = 8, 16, 32
    pre = jax.random.normal(keys[0], (N, PRE_DIM), dtype=jnp.float32)
    new = jax.random.normal(keys[1], (N, NEW_DIM), dtype=jnp.float32)

    # Projection path: gated/plain x concat/blend.
    proj_cfgs = [
        dict(concat_feature=False, use_gate=True),
        dict(concat_feature=True, use_gate=True),
        dict(concat_feature=True, use_gate=False),
        dict(concat_feature=False, use_gate=False),
    ]
    for i, cfg in enumerate(proj_cfgs):
        mod = SkipConnectionPallas(PRE_DIM, NEW_DIM, key=keys[2 + i], **cfg)
        out = jax.block_until_ready(mod(pre, new))
        ref = mod.reference(pre, new)
        assert out.shape == ref.shape, (cfg, out.shape, ref.shape)
        assert jnp.allclose(out, ref, atol=1e-4, rtol=1e-4), f"mismatch {cfg}"

    # Identity path (input_dim == output_dim): projection skipped entirely.
    pre_same = jax.random.normal(keys[6], (N, NEW_DIM), dtype=jnp.float32)
    id_cfgs = [
        dict(concat_feature=False, use_gate=False),   # pure XLA residual add
        dict(concat_feature=True, use_gate=False),
        dict(concat_feature=False, use_gate=True),
    ]
    for cfg in id_cfgs:
        mod = SkipConnectionPallas(NEW_DIM, NEW_DIM, key=keys[7], **cfg)
        out = jax.block_until_ready(mod(pre_same, new))
        ref = mod.reference(pre_same, new)
        assert out.shape == ref.shape, (cfg, out.shape, ref.shape)
        assert jnp.allclose(out, ref, atol=1e-4, rtol=1e-4), f"id mismatch {cfg}"

    # Ragged row count (N not a multiple of the row tile) -> multi-step grid
    # with a masked final block, no wrapper row-padding copy.
    pre_r = jax.random.normal(keys[8], (20, PRE_DIM), dtype=jnp.float32)
    new_r = jax.random.normal(keys[9], (20, NEW_DIM), dtype=jnp.float32)
    mod = SkipConnectionPallas(PRE_DIM, NEW_DIM, concat_feature=False,
                               use_gate=True, key=keys[4])
    out = jax.block_until_ready(mod(pre_r, new_r))
    ref = mod.reference(pre_r, new_r)
    assert out.shape == ref.shape
    assert jnp.allclose(out, ref, atol=1e-4, rtol=1e-4), "ragged mismatch"

    # Native-dtype (bf16) I/O path: activations/output travel HBM<->VMEM in
    # bf16, matmuls accumulate in f32, elementwise math stays f32.
    pre_bf = jax.random.normal(keys[10], (10, PRE_DIM),
                               dtype=jnp.float32).astype(jnp.bfloat16)
    new_bf = jax.random.normal(keys[11], (10, NEW_DIM),
                               dtype=jnp.float32).astype(jnp.bfloat16)
    mod = SkipConnectionPallas(PRE_DIM, NEW_DIM, concat_feature=False,
                               use_gate=True, key=keys[5])
    out_bf = jax.block_until_ready(mod(pre_bf, new_bf))
    assert out_bf.dtype == jnp.bfloat16 and out_bf.shape == (10, NEW_DIM)
    ref_bf = mod.reference(pre_bf.astype(jnp.float32),
                           new_bf.astype(jnp.float32))
    assert jnp.allclose(out_bf.astype(jnp.float32), ref_bf,
                        atol=0.1, rtol=0.1), "bf16 mismatch"

    print("KERNEL_OK")
</pallas_src>

<mosaic_0001>
module attributes {stable_mosaic.version = 11 : i64} {
  func.func @_gated_proj_kernel(%arg0: i32, %arg1: memref<8x128xf32, #tpu.memory_space<vmem>>, %arg2: memref<8x128xf32, #tpu.memory_space<vmem>>, %arg3: memref<128x128xf32, #tpu.memory_space<vmem>>, %arg4: memref<128x128xf32, #tpu.memory_space<vmem>>, %arg5: memref<128x128xf32, #tpu.memory_space<vmem>>, %arg6: memref<1x128xf32, #tpu.memory_space<vmem>>, %arg7: memref<8x128xf32, #tpu.memory_space<vmem>>) attributes {dimension_semantics = [#tpu.dimension_semantics<parallel>], iteration_bounds = array<i64: 1>, scalar_prefetch = 0 : i64, scratch_operands = 0 : i64, tpu.core_type = #tpu.core_type<tc>, window_params = [{transform_indices = @transform_0, window_bounds = array<i64: 8, 128>}, {transform_indices = @transform_1, window_bounds = array<i64: 8, 128>}, {pipeline_mode = #tpu.pipeline_mode<synchronous>, transform_indices = @transform_2, window_bounds = array<i64: 128, 128>}, {pipeline_mode = #tpu.pipeline_mode<synchronous>, transform_indices = @transform_3, window_bounds = array<i64: 128, 128>}, {pipeline_mode = #tpu.pipeline_mode<synchronous>, transform_indices = @transform_4, window_bounds = array<i64: 128, 128>}, {pipeline_mode = #tpu.pipeline_mode<synchronous>, transform_indices = @transform_5, window_bounds = array<i64: 1, 128>}, {transform_indices = @transform_6, window_bounds = array<i64: 8, 128>}]} {
    %c0 = arith.constant 0 : index
    %c0_0 = arith.constant 0 : index
    %0 = vector.load %arg1[%c0, %c0_0] : memref<8x128xf32, #tpu.memory_space<vmem>>, vector<8x128xf32>
    %c0_1 = arith.constant 0 : index
    %c0_2 = arith.constant 0 : index
    %1 = vector.load %arg3[%c0_1, %c0_2] : memref<128x128xf32, #tpu.memory_space<vmem>>, vector<128x128xf32>
    %cst = arith.constant dense<0.000000e+00> : vector<8x128xf32>
    %2 = tpu.matmul %0, %1, %cst {dimension_numbers = #tpu.dot_dimension_numbers<[1], [0], [0], [1], [0, 0, 1, 1], [], []>} : vector<8x128xf32>, vector<128x128xf32>, vector<8x128xf32> -> vector<8x128xf32>
    %c0_3 = arith.constant 0 : index
    %c0_4 = arith.constant 0 : index
    %3 = vector.load %arg2[%c0_3, %c0_4] : memref<8x128xf32, #tpu.memory_space<vmem>>, vector<8x128xf32>
    %c0_5 = arith.constant 0 : index
    %c0_6 = arith.constant 0 : index
    %4 = vector.load %arg4[%c0_5, %c0_6] : memref<128x128xf32, #tpu.memory_space<vmem>>, vector<128x128xf32>
    %cst_7 = arith.constant dense<0.000000e+00> : vector<8x128xf32>
    %5 = tpu.matmul %2, %4, %cst_7 {dimension_numbers = #tpu.dot_dimension_numbers<[1], [0], [0], [1], [0, 0, 1, 1], [], []>} : vector<8x128xf32>, vector<128x128xf32>, vector<8x128xf32> -> vector<8x128xf32>
    %c0_8 = arith.constant 0 : index
    %c0_9 = arith.constant 0 : index
    %6 = vector.load %arg5[%c0_8, %c0_9] : memref<128x128xf32, #tpu.memory_space<vmem>>, vector<128x128xf32>
    %cst_10 = arith.constant dense<0.000000e+00> : vector<8x128xf32>
    %7 = tpu.matmul %3, %6, %cst_10 {dimension_numbers = #tpu.dot_dimension_numbers<[1], [0], [0], [1], [0, 0, 1, 1], [], []>} : vector<8x128xf32>, vector<128x128xf32>, vector<8x128xf32> -> vector<8x128xf32>
    %8 = arith.addf %5, %7 : vector<8x128xf32>
    %c0_11 = arith.constant 0 : index
    %c0_12 = arith.constant 0 : index
    %9 = vector.load %arg6[%c0_11, %c0_12] : memref<1x128xf32, #tpu.memory_space<vmem>>, vector<1x128xf32>
    %10 = vector.broadcast %9 : vector<1x128xf32> to vector<8x128xf32>
    %11 = arith.addf %8, %10 : vector<8x128xf32>
    %12 = arith.negf %11 : vector<8x128xf32>
    %13 = math.exp %12 : vector<8x128xf32>
    %cst_13 = arith.constant 1.000000e+00 : f32
    %14 = vector.broadcast %cst_13 : f32 to vector<8x128xf32>
    %15 = arith.addf %14, %13 : vector<8x128xf32>
    %16 = arith.divf %14, %15 : vector<8x128xf32>
    %17 = arith.subf %3, %2 : vector<8x128xf32>
    %18 = arith.mulf %16, %17 : vector<8x128xf32>
    %19 = arith.addf %2, %18 : vector<8x128xf32>
    %c0_14 = arith.constant 0 : index
    %c0_15 = arith.constant 0 : index
    %20 = vector.load %arg7[%c0_14, %c0_15] : memref<8x128xf32, #tpu.memory_space<vmem>>, vector<8x128xf32>
    tpu.vector_store %arg7[%c0_14, %c0_15], %19 {strides = array<i32>} : memref<8x128xf32, #tpu.memory_space<vmem>>, vector<8x128xf32>,
    return
  }
  func.func @transform_0(%arg0: i32) -> (i32, i32) {
    %c0_i32 = arith.constant 0 : i32
    %c0_i32_0 = arith.constant 0 : i32
    return %arg0, %c0_i32 : i32, i32
  }
  func.func @transform_1(%arg0: i32) -> (i32, i32) {
    %c0_i32 = arith.constant 0 : i32
    %c0_i32_0 = arith.constant 0 : i32
    return %arg0, %c0_i32 : i32, i32
  }
  func.func @transform_2(%arg0: i32) -> (i32, i32) {
    %c0_i32 = arith.constant 0 : i32
    %c0_i32_0 = arith.constant 0 : i32
    %c0_i32_1 = arith.constant 0 : i32
    return %c0_i32, %c0_i32_0 : i32, i32
  }
  func.func @transform_3(%arg0: i32) -> (i32, i32) {
    %c0_i32 = arith.constant 0 : i32
    %c0_i32_0 = arith.constant 0 : i32
    %c0_i32_1 = arith.constant 0 : i32
    return %c0_i32, %c0_i32_0 : i32, i32
  }
  func.func @transform_4(%arg0: i32) -> (i32, i32) {
    %c0_i32 = arith.constant 0 : i32
    %c0_i32_0 = arith.constant 0 : i32
    %c0_i32_1 = arith.constant 0 : i32
    return %c0_i32, %c0_i32_0 : i32, i32
  }
  func.func @transform_5(%arg0: i32) -> (i32, i32) {
    %c0_i32 = arith.constant 0 : i32
    %c0_i32_0 = arith.constant 0 : i32
    %c0_i32_1 = arith.constant 0 : i32
    return %c0_i32, %c0_i32_0 : i32, i32
  }
  func.func @transform_6(%arg0: i32) -> (i32, i32) {
    %c0_i32 = arith.constant 0 : i32
    %c0_i32_0 = arith.constant 0 : i32
    return %arg0, %c0_i32 : i32, i32
  }
}

</mosaic_0001>

<bundles_post_ra>
// kernel: tpu_custom_call.1
= control target key start
LH: loop header
LB: loop body
LE: loop exit
PB: predicated region body
PF: predicated region fallthrough
CT: control target
= control target key end

     0   :  { %11 = vsyncpa [#allocation3], 0  ;;  %s928_s0 = inlined_call_operand.hbm [shape: f32[8,128], index: 0, kind: input, shape index: {}]   ;;  %s929_s1 = inlined_call_operand.hbm [shape: f32[8,128], index: 1, kind: input, shape index: {}]   ;;  %s930_s2 = inlined_call_operand.hbm [shape: f32[128,128], index: 2, kind: input, shape index: {}]   ;;  %s931_s3 = inlined_call_operand.hbm [shape: f32[128,128], index: 3, kind: input, shape index: {}]   ;;  %s932_s4 = inlined_call_operand.hbm [shape: f32[128,128], index: 4, kind: input, shape index: {}]   ;;  %s933_s5 = inlined_call_operand.vmem [shape: f32[1,128], index: 5, kind: input, shape index: {}]   ;;  %s934_s6 = inlined_call_operand.hbm [shape: f32[8,128], index: 6, kind: output, shape index: {}]  }
   0x1   :  { %12 = vsyncpa [#allocation6], 0 }
   0x2   :  { %13 = vsyncpa [#allocation9], 0 }
   0x3   :  { %14 = vsyncpa [#allocation4], 0  ;;  %s768_s21 = smov [#allocation5]   ;;  %s628_s25 = scalar_lea.hbm %s929_s1, 128 }
   0x4   :  { %s31_s22 = sshll.u32 %s768_s21, 4  ;;  %p629_p0 = scmp.ne.s32.totalorder %s929_s1, %s628_s25  ;;  %s32_s22 = int_to_ptr.vmem [resolvable:$true] %s31_s22 }
   0x5   :  { %p632_p1 = scmp.lt.u32.totalorder %s628_s25, %s929_s1 }
   0x7   :  { %p634_p2 = pnand %p632_p1, %p629_p0 }
   0x9   :  { %637 = shalt.err (!%p634_p2)
}
   0xa   :  { %s638_s30 = scalar_lea.vmem %s32_s22, 128  ;;  %p643_p4 = scmp.lt.s32.totalorder %s32_s22, %s32_s22 }
   0xb   :  { %p639_p3 = scmp.ne.s32.totalorder %s32_s22, %s638_s30  ;;  %p644_p5 = scmp.lt.s32.totalorder %s638_s30, %s638_s30 }
   0xd   :  { %p645_p6 = por %p644_p5, %p643_p4 }
   0xf   :  { %p646_p7 = pnand %p645_p6, %p639_p3 }
  0x11   :  { %649 = shalt.err (!%p646_p7)
}
  0x12   :  { %34 = dma.hbm_to_vmem [thread:$0]  %s929_s1, 128, %s32_s22, [#allocation6]  }
  0x13   :  { %s769_s9 = smov [#allocation8]   ;;  %s770_s11 = smov [#allocation2]  }
  0x14   :  { %s52_s10 = sshll.u32 %s769_s9, 4  ;;  %s21_s12 = sshll.u32 %s770_s11, 4  ;;  %s53_s10 = int_to_ptr.vmem [resolvable:$true] %s52_s10  ;;  %s22_s12 = int_to_ptr.vmem [resolvable:$true] %s21_s12 }
  0x15   :  { %s650_s15 = scalar_lea.hbm %s931_s3, 2048 }
  0x16   :  { %p651_p8 = scmp.ne.s32.totalorder %s931_s3, %s650_s15  ;;  %p654_p9 = scmp.lt.u32.totalorder %s650_s15, %s931_s3 }
  0x18   :  { %p656_p10 = pnand %p654_p9, %p651_p8 }
  0x1a   :  { %659 = shalt.err (!%p656_p10)
}
  0x1b   :  { %s660_s1 = scalar_lea.vmem %s53_s10, 2048  ;;  %p665_p12 = scmp.lt.s32.totalorder %s53_s10, %s53_s10 }
  0x1c   :  { %p661_p11 = scmp.ne.s32.totalorder %s53_s10, %s660_s1  ;;  %p666_p13 = scmp.lt.s32.totalorder %s660_s1, %s660_s1 }
  0x1e   :  { %p667_p0 = por %p666_p13, %p665_p12 }
  0x20   :  { %p668_p1 = pnand %p667_p0, %p661_p11 }
  0x22   :  { %671 = shalt.err (!%p668_p1)
}
  0x23   :  { %s771_s20 = smov 128   ;;  %s772_s21 = smov 8  }
  0x24   :  { %58 = dma.hbm_to_vmem [thread:$0]  %s931_s3, 2048, %s53_s10, [#allocation9], %s771_s20, %s771_s20, %s772_s21  }
  0x25   :  { %s672_s26 = scalar_lea.hbm %s928_s0, 128 }
  0x26   :  { %p673_p2 = scmp.ne.s32.totalorder %s928_s0, %s672_s26  ;;  %p676_p3 = scmp.lt.u32.totalorder %s672_s26, %s928_s0 }
  0x28   :  { %p678_p4 = pnand %p676_p3, %p673_p2 }
  0x2a   :  { %681 = shalt.err (!%p678_p4)
}
  0x2b   :  { %s682_s7 = scalar_lea.vmem %s22_s12, 128  ;;  %p687_p6 = scmp.lt.s32.totalorder %s22_s12, %s22_s12 }
  0x2c   :  { %p683_p5 = scmp.ne.s32.totalorder %s22_s12, %s682_s7  ;;  %p688_p7 = scmp.lt.s32.totalorder %s682_s7, %s682_s7 }
  0x2e   :  { %p689_p8 = por %p688_p7, %p687_p6 }
  0x30   :  { %p690_p9 = pnand %p689_p8, %p683_p5 }
  0x32   :  { %693 = shalt.err (!%p690_p9)
}
  0x33   :  { %24 = dma.hbm_to_vmem [thread:$0]  %s928_s0, 128, %s22_s12, [#allocation3]  }
  0x34   :  { %s773_s9 = smov [#allocation7]   ;;  %s774_s11 = smov [#allocation10]  }
  0x35   :  { %s40_s10 = sshll.u32 %s773_s9, 4  ;;  %s64_s13 = sshll.u32 %s774_s11, 4  ;;  %s41_s10 = int_to_ptr.vmem [resolvable:$true] %s40_s10  ;;  %s65_s13 = int_to_ptr.vmem [resolvable:$true] %s64_s13 }
  0x36   :  { %s694_s16 = scalar_lea.hbm %s930_s2, 2048 }
  0x37   :  { %p695_p10 = scmp.ne.s32.totalorder %s930_s2, %s694_s16  ;;  %p698_p11 = scmp.lt.u32.totalorder %s694_s16, %s930_s2 }
  0x39   :  { %p700_p12 = pnand %p698_p11, %p695_p10 }
  0x3b   :  { %703 = shalt.err (!%p700_p12)
}
  0x3c   :  { %s704_s0 = scalar_lea.vmem %s41_s10, 2048  ;;  %p709_p0 = scmp.lt.s32.totalorder %s41_s10, %s41_s10 }
  0x3d   :  { %p705_p13 = scmp.ne.s32.totalorder %s41_s10, %s704_s0  ;;  %p710_p1 = scmp.lt.s32.totalorder %s704_s0, %s704_s0 }
  0x3f   :  { %p711_p2 = por %p710_p1, %p709_p0 }
  0x41   :  { %p712_p3 = pnand %p711_p2, %p705_p13 }
  0x43   :  { %715 = shalt.err (!%p712_p3)
}
  0x44   :  { %46 = dma.hbm_to_vmem [thread:$0]  %s930_s2, 2048, %s41_s10, [#allocation6], %s771_s20, %s771_s20, %s772_s21  }
  0x45   :  { %s716_s25 = scalar_lea.hbm %s932_s4, 2048 }
  0x46   :  { %p717_p4 = scmp.ne.s32.totalorder %s932_s4, %s716_s25  ;;  %p720_p5 = scmp.lt.u32.totalorder %s716_s25, %s932_s4 }
  0x48   :  { %p722_p6 = pnand %p720_p5, %p717_p4 }
  0x4a   :  { %725 = shalt.err (!%p722_p6)
}
  0x4b   :  { %s726_s30 = scalar_lea.vmem %s65_s13, 2048  ;;  %p731_p8 = scmp.lt.s32.totalorder %s65_s13, %s65_s13 }
  0x4c   :  { %p727_p7 = scmp.ne.s32.totalorder %s65_s13, %s726_s30  ;;  %p732_p9 = scmp.lt.s32.totalorder %s726_s30, %s726_s30 }
  0x4e   :  { %p733_p10 = por %p732_p9, %p731_p8 }
  0x50   :  { %p734_p11 = pnand %p733_p10, %p727_p7 }
  0x52   :  { %737 = shalt.err (!%p734_p11)
}
  0x53   :  { %70 = dma.hbm_to_vmem [thread:$0]  %s932_s4, 2048, %s65_s13, [#allocation9], %s771_s20, %s771_s20, %s772_s21  }
  0x54   :  { %760 = dma.done.wait [#allocation3], 128  }
  0x55   :  { %761 = vsyncadd [#allocation3], 4294967168 }
  0x56   :  { %762 = dma.done.wait [#allocation6], 2176  }
  0x57   :  { %763 = vsyncadd [#allocation6], 4294965120 }
  0x58   :  { %764 = dma.done.wait [#allocation9], 4096  }
  0x59   :  { %765 = vsyncadd [#allocation9], 4294963200  ;;  %v775_v0 = vmov 0.0|0.0   ;;  %vm776_vm0 = vmmov 0   ;;  %v777_v1 = vmov 0.0   ;;  %v89_v2 = vld [vmem:[#allocation7] sm:$0xff] }
  0x5a   :  { %541 = vmatprep.subr.bf16.mxu0 %v775_v0  ;;  %468 = vmatprep.mubr.msk.f32.mxu0 %vm776_vm0, %v777_v1  ;;  %v90_v3 = vld [vmem:[#allocation7 + $0x8] sm:$0xff]  ;;  %v91_v4 = vld [vmem:[#allocation7 + $0x10] sm:$0xff]  ;;  %v92_v6 = vld [vmem:[#allocation7 + $0x18] sm:$0xff]  ;;  %s778_s21 = smov [#allocation11]  }
  0x5b   :  { %565 = vmatprep.subr.bf16.mxu1 %v775_v0  ;;  %503 = vmatprep.mubr.msk.f32.mxu1 %vm776_vm0, %v777_v1  ;;  %v542_v5 = vpack.c.bf16 %v90_v3, %v89_v2  ;;  %v545_v7 = vpack.c.bf16 %v92_v6, %v91_v4  ;;  %v93_v8 = vld [vmem:[#allocation7 + $0x20] sm:$0xff]  ;;  %v94_v9 = vld [vmem:[#allocation7 + $0x28] sm:$0xff]  ;;  %v194_v14 = vld [vmem:[#allocation10 + $0x10] sm:$0xff]  ;;  %s372_s3 = sshll.u32 %s778_s21, 4  ;;  %s373_s3 = int_to_ptr.vmem [resolvable:$true] %s372_s3 }
  0x5c   :  { %v192_v10 = vld [vmem:[#allocation10] sm:$0xff]  ;;  %v193_v11 = vld [vmem:[#allocation10 + $0x8] sm:$0xff]  ;;  %v548_v12 = vpack.c.bf16 %v94_v9, %v93_v8  ;;  %v195_v15 = vld [vmem:[#allocation10 + $0x18] sm:$0xff]  ;;  %s738_s8 = scalar_lea.vmem %s373_s3, 128  ;;  %p743_p13 = scmp.lt.s32.totalorder %s373_s3, %s373_s3 }
  0x5d   :  { %543 = vmatpush3.bf16.msra.mxu0 %v542_v5  ;;  %v566_v13 = vpack.c.bf16 %v193_v11, %v192_v10  ;;  %v95_v16 = vld [vmem:[#allocation7 + $0x30] sm:$0xff]  ;;  %v96_v17 = vld [vmem:[#allocation7 + $0x38] sm:$0xff]  ;;  %v569_v18 = vpack.c.bf16 %v195_v15, %v194_v14  ;;  %v196_v19 = vld [vmem:[#allocation10 + $0x20] sm:$0xff]  ;;  %p739_p12 = scmp.ne.s32.totalorder %s373_s3, %s738_s8  ;;  %p744_p0 = scmp.lt.s32.totalorder %s738_s8, %s738_s8 }
  0x5e   :  { %544 = vmatprep.subr.bf16.mxu0 %v775_v0  ;;  %v197_v20 = vld [vmem:[#allocation10 + $0x28] sm:$0xff]  ;;  %v551_v21 = vpack.c.bf16 %v96_v17, %v95_v16  ;;  %v97_v22 = vld [vmem:[#allocation7 + $0x40] sm:$0xff]  ;;  %v198_v25 = vld [vmem:[#allocation10 + $0x30] sm:$0xff] }
  0x5f   :  { %567 = vmatpush3.bf16.msra.mxu1 %v566_v13  ;;  %v98_v23 = vld [vmem:[#allocation7 + $0x48] sm:$0xff]  ;;  %v572_v24 = vpack.c.bf16 %v197_v20, %v196_v19  ;;  %v199_v26 = vld [vmem:[#allocation10 + $0x38] sm:$0xff]  ;;  %v99_v28 = vld [vmem:[#allocation7 + $0x50] sm:$0xff]  ;;  %p745_p1 = por %p744_p0, %p743_p13 }
  0x60   :  { %568 = vmatprep.subr.bf16.mxu1 %v775_v0  ;;  %v554_v27 = vpack.c.bf16 %v98_v23, %v97_v22  ;;  %v100_v29 = vld [vmem:[#allocation7 + $0x58] sm:$0xff]  ;;  %v575_v30 = vpack.c.bf16 %v199_v26, %v198_v25  ;;  %v200_v31 = vld [vmem:[#allocation10 + $0x40] sm:$0xff]  ;;  %v201_v32 = vld [vmem:[#allocation10 + $0x48] sm:$0xff] }
  0x61   :  { %546 = vmatpush3.bf16.msra.mxu0 %v545_v7  ;;  %v557_v33 = vpack.c.bf16 %v100_v29, %v99_v28  ;;  %v101_v34 = vld [vmem:[#allocation7 + $0x60] sm:$0xff]  ;;  %v102_v35 = vld [vmem:[#allocation7 + $0x68] sm:$0xff]  ;;  %v578_v36 = vpack.c.bf16 %v201_v32, %v200_v31  ;;  %v202_v37 = vld [vmem:[#allocation10 + $0x50] sm:$0xff]  ;;  %p746_p2 = pnand %p745_p1, %p739_p12 }
  0x62   :  { %547 = vmatprep.subr.bf16.mxu0 %v775_v0  ;;  %v203_v38 = vld [vmem:[#allocation10 + $0x58] sm:$0xff]  ;;  %v560_v39 = vpack.c.bf16 %v102_v35, %v101_v34  ;;  %v103_v40 = vld [vmem:[#allocation7 + $0x70] sm:$0xff]  ;;  %v204_v43 = vld [vmem:[#allocation10 + $0x60] sm:$0xff] }
  0x63   :  { %570 = vmatpush3.bf16.msra.mxu1 %v569_v18  ;;  %v104_v41 = vld [vmem:[#allocation7 + $0x78] sm:$0xff]  ;;  %v581_v42 = vpack.c.bf16 %v203_v38, %v202_v37  ;;  %v205_v44 = vld [vmem:[#allocation10 + $0x68] sm:$0xff]  ;;  %v176_v46 = vld [vmem:[#allocation8] sm:$0xff] }
  0x64   :  { %571 = vmatprep.subr.bf16.mxu1 %v775_v0  ;;  %v563_v45 = vpack.c.bf16 %v104_v41, %v103_v40  ;;  %v177_v47 = vld [vmem:[#allocation8 + $0x8] sm:$0xff]  ;;  %v584_v48 = vpack.c.bf16 %v205_v44, %v204_v43  ;;  %v206_v49 = vld [vmem:[#allocation10 + $0x70] sm:$0xff]  ;;  %v207_v50 = vld [vmem:[#allocation10 + $0x78] sm:$0xff] }
  0x65   :  { %549 = vmatpush3.bf16.msra.mxu0 %v548_v12  ;;  %v88_v51 = vld [vmem:[#allocation2] sm:$0xff]  ;;  %v590_v52 = vpack.c.bf16 %v177_v47, %v176_v46  ;;  %v179_v54 = vld [vmem:[#allocation8 + $0x18] sm:$0xff]  ;;  %v587_v55 = vpack.c.bf16 %v207_v50, %v206_v49  ;;  %v180_v57 = vld [vmem:[#allocation8 + $0x20] sm:$0xff] }
  0x66   :  { %550 = vmatprep.subr.bf16.mxu0 %v775_v0  ;;  %v178_v53 = vld [vmem:[#allocation8 + $0x10] sm:$0xff]  ;;  %v181_v58 = vld [vmem:[#allocation8 + $0x28] sm:$0xff]  ;;  %v183_v61 = vld [vmem:[#allocation8 + $0x38] sm:$0xff] }
  0x67   :  { %573 = vmatpush3.bf16.msra.mxu1 %v572_v24  ;;  %v593_v56 = vpack.c.bf16 %v179_v54, %v178_v53  ;;  %v596_v59 = vpack.c.bf16 %v181_v58, %v180_v57  ;;  %v182_v60 = vld [vmem:[#allocation8 + $0x30] sm:$0xff]  ;;  %v184_v63 = vld [vmem:[#allocation8 + $0x40] sm:$0xff]  ;;  %v185_v2 = vld [vmem:[#allocation8 + $0x48] sm:$0xff] }
  0x68   :  { %574 = vmatprep.subr.bf16.mxu1 %v775_v0  ;;  %v599_v62 = vpack.c.bf16 %v183_v61, %v182_v60  ;;  %v602_v3 = vpack.c.bf16 %v185_v2, %v184_v63  ;;  %v187_v4 = vld [vmem:[#allocation8 + $0x58] sm:$0xff]  ;;  %v188_v6 = vld [vmem:[#allocation8 + $0x60] sm:$0xff]  ;;  %v189_v7 = vld [vmem:[#allocation8 + $0x68] sm:$0xff] }
  0x69   :  { %552 = vmatpush3.bf16.msra.mxu0 %v551_v21  ;;  %v608_v8 = vpack.c.bf16 %v189_v7, %v188_v6  ;;  %v190_v9 = vld [vmem:[#allocation8 + $0x70] sm:$0xff]  ;;  %v191_v10 = vld [vmem:[#allocation8 + $0x78] sm:$0xff] }
  0x6a   :  { %553 = vmatprep.subr.bf16.mxu0 %v775_v0  ;;  %v611_v11 = vpack.c.bf16 %v191_v10, %v190_v9  ;;  %v175_v12 = vld [vmem:[#allocation5] sm:$0xff]  ;;  %v383_v18 = vld [vmem:[%s933_s5] ss:$0 sm:$0xff] }
  0x6b   :  { %576 = vmatpush3.bf16.msra.mxu1 %v575_v30 }
  0x6c   :  { %577 = vmatprep.subr.bf16.mxu1 %v775_v0 }
  0x6d   :  { %555 = vmatpush3.bf16.msra.mxu0 %v554_v27 }
  0x6e   :  { %556 = vmatprep.subr.bf16.mxu0 %v775_v0 }
  0x6f   :  { %579 = vmatpush3.bf16.msra.mxu1 %v578_v36 }
  0x70   :  { %580 = vmatprep.subr.bf16.mxu1 %v775_v0 }
  0x71   :  { %558 = vmatpush3.bf16.msra.mxu0 %v557_v33 }
  0x72   :  { %559 = vmatprep.subr.bf16.mxu0 %v775_v0 }
  0x73   :  { %582 = vmatpush3.bf16.msra.mxu1 %v581_v42 }
  0x74   :  { %583 = vmatprep.subr.bf16.mxu1 %v775_v0 }
  0x75   :  { %561 = vmatpush3.bf16.msra.mxu0 %v560_v39 }
  0x76   :  { %562 = vmatprep.subr.bf16.mxu0 %v775_v0 }
  0x77   :  { %585 = vmatpush3.bf16.msra.mxu1 %v584_v48 }
  0x78   :  { %586 = vmatprep.subr.bf16.mxu1 %v775_v0 }
  0x79   :  { %564 = vmatpush3.bf16.msra.mxu0 %v563_v45 }
  0x7a   :  { %589 = vmatprep.subr.bf16.mxu0 %v775_v0 }
  0x7b   :  { %588 = vmatpush3.bf16.msra.mxu1 %v587_v55 }
  0x7c   :  { %469 = vmatmul.mubr.f32.vlgmr.msra.gmra.mrb[0].mxu0 %v88_v51 }
  0x7d   :  { %591 = vmatpush3.bf16.msra.mxu0 %v590_v52  ;;  %538 = vmatprep.mubr.msk.f32.mxu0 %vm776_vm0, %v777_v1  ;;  %v186_v1 = vld [vmem:[#allocation8 + $0x50] sm:$0xff] }
  0x7e   :  { %592 = vmatprep.subr.bf16.mxu0 %v775_v0  ;;  %v605_v5 = vpack.c.bf16 %v187_v4, %v186_v1  ;;  %504 = vmatmul.mubr.f32.vlgmr.msra.gmra.mrb[0].mxu1 %v175_v12 }
  0x81   :  { %594 = vmatpush3.bf16.msra.mxu0 %v593_v56 }
  0x82   :  { %595 = vmatprep.subr.bf16.mxu0 %v775_v0 }
  0x85   :  { %597 = vmatpush3.bf16.msra.mxu0 %v596_v59 }
  0x86   :  { %598 = vmatprep.subr.bf16.mxu0 %v775_v0 }
  0x89   :  { %600 = vmatpush3.bf16.msra.mxu0 %v599_v62 }
  0x8a   :  { %601 = vmatprep.subr.bf16.mxu0 %v775_v0 }
  0x8d   :  { %603 = vmatpush3.bf16.msra.mxu0 %v602_v3 }
  0x8e   :  { %604 = vmatprep.subr.bf16.mxu0 %v775_v0 }
  0x91   :  { %606 = vmatpush3.bf16.msra.mxu0 %v605_v5 }
  0x92   :  { %607 = vmatprep.subr.bf16.mxu0 %v775_v0 }
  0x95   :  { %609 = vmatpush3.bf16.msra.mxu0 %v608_v8 }
  0x96   :  { %610 = vmatprep.subr.bf16.mxu0 %v775_v0 }
  0x99   :  { %612 = vmatpush3.bf16.msra.mxu0 %v611_v11 }
 0x14f   :  { %v171_v13 = vpop.f32.mrb[0].mxu0 }
 0x150   :  { %v470_v14 = vpop.f32.mrb[1].mxu0  ;;  %539 = vmatmul.mubr.f32.vlgmr.msra.gmra.mrb[2].mxu0 %v171_v13  ;;  %v362_v24 = vsub.f32 %v175_v12, %v171_v13 }
 0x151   :  { %v274_v15 = vpop.f32.mrb[0].mxu1 }
 0x152   :  { %v505_v16 = vpop.f32.mrb[1].mxu1 }
 0x223   :  { %v344_v17 = vpop.f32.mrb[2].mxu0 }
 0x224   :  { %v345_v19 = vadd.f32 %v344_v17, %v274_v15  ;;  %v540_v20 = vpop.f32.mrb[3].mxu0 }
 0x226   :  { %v355_v21 = vadd.f32 %v383_v18, %v345_v19 }
 0x228   :  { %v384_v22 = vmul.f32 -1.442695, %v355_v21 }
 0x22a   :  { %624 = vpow2.f32 %v384_v22 }
 0x234   :  { %v625_v23 = vpop.eup %624 }
 0x235   :  { %v359_v0 = vadd.f32 1.0, %v625_v23 }
 0x237   :  { %626 = vrcp.f32 %v359_v0 }
 0x241   :  { %v627_v25 = vpop.eup %626 }
 0x242   :  { %v363_v26 = vmul.f32 %v627_v25, %v362_v24 }
 0x244   :  { %v364_v27 = vadd.f32 %v363_v26, %v171_v13 }
 0x246   :  { %365 = vst [vmem:[#allocation11] sm:$0xff] %v364_v27 }
 0x247   :  { %749 = shalt.err (!%p746_p2)
}
 0x248   :  { %s750_s10 = scalar_lea.hbm %s934_s6, 128 }
 0x249   :  { %p751_p3 = scmp.ne.s32.totalorder %s934_s6, %s750_s10  ;;  %p754_p4 = scmp.lt.u32.totalorder %s750_s10, %s934_s6 }
 0x24b   :  { %p756_p5 = pnand %p754_p4, %p751_p3 }
 0x24d   :  { %759 = shalt.err (!%p756_p5)
}
 0x24e   :  { %375 = dma.vmem_to_hbm [thread:$0]  %s373_s3, 128, %s934_s6, [#allocation4]  }
 0x24f   :  { %766 = dma.done.wait [#allocation4], 128  }
 0x250   :  { %767 = vsyncadd [#allocation4], 4294967168 }
 0x251   :  { %379 = vsyncpa [#allocation3], 1 }
 0x252   :  { %380 = vsyncpa [#allocation6], 1 }
 0x253   :  { %381 = vsyncpa [#allocation9], 1 }
 0x254   :  { %382 = vsyncpa [#allocation4], 1 }

</bundles_post_ra>
